<compile_context>
chip_gen: v7x
topology: tpu7x:2x2x1
jax: 0.10.0
libtpu: 0.0.40
codegen_flags: <defaults>
</compile_context>

<pallas_src>
import functools

import jax
import jax.numpy as jnp
from jax import lax
from jax.experimental import pallas as pl
from jax.experimental.pallas import tpu as pltpu

EPS = 1e-3  # nn.BatchNorm2d(..., eps=0.001) in the reference module


# ---------------------------------------------------------------------------
# In-kernel helpers
# ---------------------------------------------------------------------------
def _bn_norm(y, s_ref, q_ref, g_ref, be_ref, inv_m):
    """Training-mode BN from streaming sum / sum-of-squares (biased variance)."""
    mean = s_ref[...] * inv_m
    # NOTE: E[y^2] - mean^2 streaming form; fine at these sizes (mean ~ 0).
    var = q_ref[...] * inv_m - mean * mean
    inv_std = lax.rsqrt(var + EPS)
    return g_ref[...] * ((y - mean) * inv_std) + be_ref[...]


def _accum_stats(y, s_ref, q_ref, is_first):
    """Accumulate per-channel sum / sum-of-squares into grid-resident outputs."""
    @pl.when(is_first)
    def _():
        s_ref[...] = jnp.zeros_like(s_ref)
        q_ref[...] = jnp.zeros_like(q_ref)

    s_ref[...] += jnp.sum(y, axis=-1, keepdims=True)
    q_ref[...] += jnp.sum(y * y, axis=-1, keepdims=True)


# ---------------------------------------------------------------------------
# K1: 1x1 conv (no bias), lane-dense, + raw BN stats
# ---------------------------------------------------------------------------
def _stage1_kernel(x_ref, w_ref, y_ref, s_ref, q_ref):
    is_first = jnp.logical_and(pl.program_id(0) == 0, pl.program_id(1) == 0)
    x = x_ref[0]                                                  # (Cin, T)
    y = jnp.dot(w_ref[...], x, preferred_element_type=jnp.float32)  # (Cint, T)
    y_ref[0] = y
    _accum_stats(y, s_ref, q_ref, is_first)


# ---------------------------------------------------------------------------
# K2: bn1 + relu + 3x3 conv (pad=1, bias) via 9 rolled/masked matmuls + stats2
# ---------------------------------------------------------------------------
def _stage2_kernel(y1_ref, s1_ref, q1_ref, g1_ref, be1_ref, w2_ref, cb_ref,
                   y2_ref, s2_ref, q2_ref, *, inv_m, H, W):
    is_first = pl.program_id(0) == 0
    hw = H * W

    h = _bn_norm(y1_ref[0], s1_ref, q1_ref, g1_ref, be1_ref, inv_m)
    h = jnp.maximum(h, 0.0)                                       # (Cint, HW)

    idx = lax.broadcasted_iota(jnp.int32, (1, hw), 1)
    row = idx // W
    col = idx % W

    cint = h.shape[0]
    acc = jnp.zeros((w2_ref.shape[1], hw), jnp.float32)
    for dy in (-1, 0, 1):
        for dx in (-1, 0, 1):
            s = dy * W + dx
            shifted = h if s == 0 else pltpu.roll(h, shift=(-s) % hw, axis=1)
            # zero-padding semantics: mask lanes whose source pixel is outside
            # the image (the roll wraps rows / samples otherwise).
            conds = []
            if dy == -1:
                conds.append(row >= 1)
            if dy == 1:
                conds.append(row <= H - 2)
            if dx == -1:
                conds.append(col >= 1)
            if dx == 1:
                conds.append(col <= W - 2)
            if conds:
                valid = functools.reduce(jnp.logical_and, conds)
                shifted = jnp.where(valid, shifted, 0.0)
            k = (dy + 1) * 3 + (dx + 1)
            acc = acc + jnp.dot(w2_ref[k], shifted,
                                preferred_element_type=jnp.float32)

    y2 = acc + cb_ref[...]                                        # conv bias
    y2_ref[0] = y2
    _accum_stats(y2, s2_ref, q2_ref, is_first)


# ---------------------------------------------------------------------------
# K3: bn2 + relu + 1x1 conv (no bias) + stats3
# ---------------------------------------------------------------------------
def _stage3_kernel(y2_ref, s2_ref, q2_ref, g2_ref, be2_ref, w3_ref,
                   y3_ref, s3_ref, q3_ref, *, inv_m):
    is_first = jnp.logical_and(pl.program_id(0) == 0, pl.program_id(1) == 0)
    h = _bn_norm(y2_ref[0], s2_ref, q2_ref, g2_ref, be2_ref, inv_m)
    h = jnp.maximum(h, 0.0)                                       # (Cint, T)
    y3 = jnp.dot(w3_ref[...], h, preferred_element_type=jnp.float32)  # (Cout, T)
    y3_ref[0] = y3
    _accum_stats(y3, s3_ref, q3_ref, is_first)


# ---------------------------------------------------------------------------
# K4: bn3 (no ReLU) -> output (parallel grid)
# ---------------------------------------------------------------------------
def _stage4_kernel(y3_ref, s3_ref, q3_ref, g3_ref, be3_ref, o_ref, *, inv_m):
    o_ref[0] = _bn_norm(y3_ref[0], s3_ref, q3_ref, g3_ref, be3_ref, inv_m)


# ---------------------------------------------------------------------------
# Wrapper
# ---------------------------------------------------------------------------
def _pick_hw_tile(hw, max_tile=2048):
    """Full H*W if it is small; else the largest multiple-of-128 divisor
    <= max_tile (falls back to full H*W). Keeps blocks lane-dense and well
    inside the v7x 64 MiB VMEM budget at production sizes."""
    if hw <= max_tile:
        return hw
    t = (max_tile // 128) * 128
    while t >= 128:
        if hw % t == 0:
            return t
        t -= 128
    return hw


def decoder_main_path(x_nchw, p):
    N, Cin, H, W = x_nchw.shape
    Cint = p['w1_mat'].shape[0]
    Cout = p['w3_mat'].shape[0]
    HW = H * W
    inv_m = 1.0 / float(N * HW)
    T = _pick_hw_tile(HW)
    nT = HW // T

    x = x_nchw.reshape(N, Cin, HW)             # free reshape, stays NC(HW)

    col = lambda c: pl.BlockSpec((c, 1), lambda n, t: (0, 0))
    col1 = lambda c: pl.BlockSpec((c, 1), lambda n: (0, 0))

    # ---- K1: conv1x1 + stats1 ---------------------------------------------
    y1, s1, q1 = pl.pallas_call(
        _stage1_kernel,
        out_shape=(jax.ShapeDtypeStruct((N, Cint, HW), jnp.float32),
                   jax.ShapeDtypeStruct((Cint, 1), jnp.float32),
                   jax.ShapeDtypeStruct((Cint, 1), jnp.float32)),
        grid=(N, nT),
        in_specs=[pl.BlockSpec((1, Cin, T), lambda n, t: (n, 0, t)),
                  pl.BlockSpec((Cint, Cin), lambda n, t: (0, 0))],
        out_specs=(pl.BlockSpec((1, Cint, T), lambda n, t: (n, 0, t)),
                   col(Cint), col(Cint)),
        compiler_params=pltpu.CompilerParams(
            dimension_semantics=("arbitrary", "arbitrary")),
    )(x, p['w1_mat'])

    # ---- K2: bn1+relu + conv3x3(+bias) + stats2 (im2col fused) -------------
    k2 = functools.partial(_stage2_kernel, inv_m=inv_m, H=H, W=W)
    y2, s2, q2 = pl.pallas_call(
        k2,
        out_shape=(jax.ShapeDtypeStruct((N, Cint, HW), jnp.float32),
                   jax.ShapeDtypeStruct((Cint, 1), jnp.float32),
                   jax.ShapeDtypeStruct((Cint, 1), jnp.float32)),
        grid=(N,),
        in_specs=[pl.BlockSpec((1, Cint, HW), lambda n: (n, 0, 0)),
                  col1(Cint), col1(Cint), col1(Cint), col1(Cint),
                  pl.BlockSpec((9, Cint, Cint), lambda n: (0, 0, 0)),
                  col1(Cint)],
        out_specs=(pl.BlockSpec((1, Cint, HW), lambda n: (n, 0, 0)),
                   col1(Cint), col1(Cint)),
        compiler_params=pltpu.CompilerParams(
            dimension_semantics=("arbitrary",)),
    )(y1, s1, q1, p['g1'], p['be1'], p['w2_shift'], p['b2'])

    # ---- K3: bn2+relu + conv1x1 + stats3 ------------------------------------
    k3 = functools.partial(_stage3_kernel, inv_m=inv_m)
    y3, s3, q3 = pl.pallas_call(
        k3,
        out_shape=(jax.ShapeDtypeStruct((N, Cout, HW), jnp.float32),
                   jax.ShapeDtypeStruct((Cout, 1), jnp.float32),
                   jax.ShapeDtypeStruct((Cout, 1), jnp.float32)),
        grid=(N, nT),
        in_specs=[pl.BlockSpec((1, Cint, T), lambda n, t: (n, 0, t)),
                  col(Cint), col(Cint), col(Cint), col(Cint),
                  pl.BlockSpec((Cout, Cint), lambda n, t: (0, 0))],
        out_specs=(pl.BlockSpec((1, Cout, T), lambda n, t: (n, 0, t)),
                   col(Cout), col(Cout)),
        compiler_params=pltpu.CompilerParams(
            dimension_semantics=("arbitrary", "arbitrary")),
    )(y2, s2, q2, p['g2'], p['be2'], p['w3_mat'])

    # ---- K4: bn3 -> output (parallel, megacore-shardable) -------------------
    k4 = functools.partial(_stage4_kernel, inv_m=inv_m)
    out = pl.pallas_call(
        k4,
        out_shape=jax.ShapeDtypeStruct((N, Cout, HW), jnp.float32),
        grid=(N, nT),
        in_specs=[pl.BlockSpec((1, Cout, T), lambda n, t: (n, 0, t)),
                  col(Cout), col(Cout), col(Cout), col(Cout)],
        out_specs=pl.BlockSpec((1, Cout, T), lambda n, t: (n, 0, t)),
        compiler_params=pltpu.CompilerParams(
            dimension_semantics=("parallel", "parallel")),
    )(y3, s3, q3, p['g3'], p['be3'])

    return out.reshape(N, Cout, H, W)


# ---------------------------------------------------------------------------
# Parameters (deterministic; PyTorch OIHW conv weights kept for the reference)
# ---------------------------------------------------------------------------
def init_params(key, input_channels, output_channels):
    internal = output_channels // 4
    ks = jax.random.split(key, 10)
    p = {}
    p['w1_oihw'] = 0.1 * jax.random.normal(ks[0], (internal, input_channels, 1, 1), jnp.float32)
    p['w2_oihw'] = 0.1 * jax.random.normal(ks[1], (internal, internal, 3, 3), jnp.float32)
    p['b2_vec'] = 0.1 * jax.random.normal(ks[2], (internal,), jnp.float32)
    p['w3_oihw'] = 0.1 * jax.random.normal(ks[3], (output_channels, internal, 1, 1), jnp.float32)
    p['g1_vec'] = 1.0 + 0.1 * jax.random.normal(ks[4], (internal,), jnp.float32)
    p['be1_vec'] = 0.1 * jax.random.normal(ks[5], (internal,), jnp.float32)
    p['g2_vec'] = 1.0 + 0.1 * jax.random.normal(ks[6], (internal,), jnp.float32)
    p['be2_vec'] = 0.1 * jax.random.normal(ks[7], (internal,), jnp.float32)
    p['g3_vec'] = 1.0 + 0.1 * jax.random.normal(ks[8], (output_channels,), jnp.float32)
    p['be3_vec'] = 0.1 * jax.random.normal(ks[9], (output_channels,), jnp.float32)

    # Kernel-side (lane-dense) forms: out = W (Cout,Cin) @ x (Cin, M)
    p['w1_mat'] = p['w1_oihw'][:, :, 0, 0]                                   # (Cint, Cin)
    p['w2_shift'] = jnp.transpose(p['w2_oihw'], (2, 3, 0, 1)).reshape(9, internal, internal)
    p['w3_mat'] = p['w3_oihw'][:, :, 0, 0]                                   # (Cout, Cint)
    p['b2'] = p['b2_vec'].reshape(-1, 1)
    for name in ('g1', 'be1', 'g2', 'be2', 'g3', 'be3'):
        p[name] = p[name + '_vec'].reshape(-1, 1)
    return p


# ---------------------------------------------------------------------------
# Pure-JAX reference (training-mode BN, eps=1e-3)
# ---------------------------------------------------------------------------
def _bn_train_ref(y_nchw, gamma, beta):
    mean = jnp.mean(y_nchw, axis=(0, 2, 3), keepdims=True)
    var = jnp.mean((y_nchw - mean) ** 2, axis=(0, 2, 3), keepdims=True)
    return (gamma[None, :, None, None] * (y_nchw - mean) / jnp.sqrt(var + EPS)
            + beta[None, :, None, None])


def decoder_main_path_ref(x, p):
    dn = ('NCHW', 'OIHW', 'NCHW')
    y = lax.conv_general_dilated(x, p['w1_oihw'], (1, 1), 'VALID', dimension_numbers=dn)
    y = jax.nn.relu(_bn_train_ref(y, p['g1_vec'], p['be1_vec']))
    y = lax.conv_general_dilated(y, p['w2_oihw'], (1, 1), ((1, 1), (1, 1)), dimension_numbers=dn)
    y = y + p['b2_vec'][None, :, None, None]
    y = jax.nn.relu(_bn_train_ref(y, p['g2_vec'], p['be2_vec']))
    y = lax.conv_general_dilated(y, p['w3_oihw'], (1, 1), 'VALID', dimension_numbers=dn)
    y = _bn_train_ref(y, p['g3_vec'], p['be3_vec'])
    return y


if __name__ == "__main__":
    key = jax.random.PRNGKey(0)
    k_x, k_p = jax.random.split(key)

    # Small shapes consistent with DecoderMainPath(8, 16): Cint = 4
    N, Cin, H, W = 2, 8, 16, 16
    Cout = 16
    x = jax.random.normal(k_x, (N, Cin, H, W), jnp.float32)
    params = init_params(k_p, Cin, Cout)

    out = jax.block_until_ready(decoder_main_path(x, params))
    ref = jax.block_until_ready(decoder_main_path_ref(x, params))

    assert out.shape == (N, Cout, H, W), out.shape
    assert jnp.allclose(out, ref, rtol=1e-3, atol=1e-3), float(jnp.max(jnp.abs(out - ref)))

    print("KERNEL_OK")
</pallas_src>

<mosaic_0001>
module attributes {stable_mosaic.version = 11 : i64} {
  func.func @_stage1_kernel(%arg0: i32, %arg1: i32, %arg2: memref<1x8x256xf32, #tpu.memory_space<vmem>>, %arg3: memref<4x8xf32, #tpu.memory_space<vmem>>, %arg4: memref<1x4x256xf32, #tpu.memory_space<vmem>>, %arg5: memref<4x1xf32, #tpu.memory_space<vmem>>, %arg6: memref<4x1xf32, #tpu.memory_space<vmem>>) attributes {dimension_semantics = [#tpu.dimension_semantics<arbitrary>, #tpu.dimension_semantics<arbitrary>], iteration_bounds = array<i64: 2, 1>, scalar_prefetch = 0 : i64, scratch_operands = 0 : i64, tpu.core_type = #tpu.core_type<tc>, window_params = [{transform_indices = @transform_0, window_bounds = array<i64: 1, 8, 256>}, {pipeline_mode = #tpu.pipeline_mode<synchronous>, transform_indices = @transform_1, window_bounds = array<i64: 4, 8>}, {transform_indices = @transform_2, window_bounds = array<i64: 1, 4, 256>}, {pipeline_mode = #tpu.pipeline_mode<synchronous>, transform_indices = @transform_3, window_bounds = array<i64: 4, 1>}, {pipeline_mode = #tpu.pipeline_mode<synchronous>, transform_indices = @transform_4, window_bounds = array<i64: 4, 1>}]} {
    %c0_i32 = arith.constant 0 : i32
    %0 = arith.cmpi eq, %arg0, %c0_i32 : i32
    %c0_i32_0 = arith.constant 0 : i32
    %1 = arith.cmpi eq, %arg1, %c0_i32_0 : i32
    %2 = arith.andi %0, %1 : i1
    %c0 = arith.constant 0 : index
    %c0_1 = arith.constant 0 : index
    %c0_2 = arith.constant 0 : index
    %3 = vector.load %arg2[%c0, %c0_1, %c0_2] : memref<1x8x256xf32, #tpu.memory_space<vmem>>, vector<1x8x256xf32>
    %4 = vector.shape_cast %3 : vector<1x8x256xf32> to vector<8x256xf32>
    %c0_3 = arith.constant 0 : index
    %c0_4 = arith.constant 0 : index
    %5 = vector.load %arg3[%c0_3, %c0_4] : memref<4x8xf32, #tpu.memory_space<vmem>>, vector<4x8xf32>
    %cst = arith.constant dense<0.000000e+00> : vector<4x256xf32>
    %6 = tpu.matmul %5, %4, %cst {dimension_numbers = #tpu.dot_dimension_numbers<[1], [0], [0], [1], [0, 0, 1, 1], [], []>} : vector<4x8xf32>, vector<8x256xf32>, vector<4x256xf32> -> vector<4x256xf32>
    %c0_5 = arith.constant 0 : index
    %c0_6 = arith.constant 0 : index
    %c0_7 = arith.constant 0 : index
    %7 = vector.load %arg4[%c0_5, %c0_6, %c0_7] : memref<1x4x256xf32, #tpu.memory_space<vmem>>, vector<1x4x256xf32>
    %8 = vector.shape_cast %7 : vector<1x4x256xf32> to vector<4x256xf32>
    %9 = vector.shape_cast %6 : vector<4x256xf32> to vector<1x4x256xf32>
    tpu.vector_store %arg4[%c0_5, %c0_6, %c0_7], %9 {strides = array<i32>} : memref<1x4x256xf32, #tpu.memory_space<vmem>>, vector<1x4x256xf32>,
    %10 = arith.extui %2 : i1 to i32
    %c0_i32_8 = arith.constant 0 : i32
    %11 = arith.cmpi ne, %10, %c0_i32_8 : i32
    scf.if %11 {
      %cst_19 = arith.constant 0.000000e+00 : f32
      %23 = vector.broadcast %cst_19 : f32 to vector<4x1xf32>
      %c0_20 = arith.constant 0 : index
      %c0_21 = arith.constant 0 : index
      %24 = vector.load %arg5[%c0_20, %c0_21] : memref<4x1xf32, #tpu.memory_space<vmem>>, vector<4x1xf32>
      tpu.vector_store %arg5[%c0_20, %c0_21], %23 {strides = array<i32>} : memref<4x1xf32, #tpu.memory_space<vmem>>, vector<4x1xf32>,
      %cst_22 = arith.constant 0.000000e+00 : f32
      %25 = vector.broadcast %cst_22 : f32 to vector<4x1xf32>
      %c0_23 = arith.constant 0 : index
      %c0_24 = arith.constant 0 : index
      %26 = vector.load %arg6[%c0_23, %c0_24] : memref<4x1xf32, #tpu.memory_space<vmem>>, vector<4x1xf32>
      tpu.vector_store %arg6[%c0_23, %c0_24], %25 {strides = array<i32>} : memref<4x1xf32, #tpu.memory_space<vmem>>, vector<4x1xf32>,
    } else {
    }
    %c0_9 = arith.constant 0 : index
    %c0_10 = arith.constant 0 : index
    %12 = vector.load %arg5[%c0_9, %c0_10] : memref<4x1xf32, #tpu.memory_space<vmem>>, vector<4x1xf32>
    %cst_11 = arith.constant dense<0.000000e+00> : vector<4xf32>
    %13 = vector.multi_reduction <add>, %6, %cst_11 [1] : vector<4x256xf32> to vector<4xf32>
    %14 = vector.shape_cast %13 : vector<4xf32> to vector<4x1xf32>
    %15 = arith.addf %12, %14 : vector<4x1xf32>
    %c0_12 = arith.constant 0 : index
    %c0_13 = arith.constant 0 : index
    %16 = vector.load %arg5[%c0_12, %c0_13] : memref<4x1xf32, #tpu.memory_space<vmem>>, vector<4x1xf32>
    tpu.vector_store %arg5[%c0_12, %c0_13], %15 {strides = array<i32>} : memref<4x1xf32, #tpu.memory_space<vmem>>, vector<4x1xf32>,
    %c0_14 = arith.constant 0 : index
    %c0_15 = arith.constant 0 : index
    %17 = vector.load %arg6[%c0_14, %c0_15] : memref<4x1xf32, #tpu.memory_space<vmem>>, vector<4x1xf32>
    %18 = arith.mulf %6, %6 : vector<4x256xf32>
    %cst_16 = arith.constant dense<0.000000e+00> : vector<4xf32>
    %19 = vector.multi_reduction <add>, %18, %cst_16 [1] : vector<4x256xf32> to vector<4xf32>
    %20 = vector.shape_cast %19 : vector<4xf32> to vector<4x1xf32>
    %21 = arith.addf %17, %20 : vector<4x1xf32>
    %c0_17 = arith.constant 0 : index
    %c0_18 = arith.constant 0 : index
    %22 = vector.load %arg6[%c0_17, %c0_18] : memref<4x1xf32, #tpu.memory_space<vmem>>, vector<4x1xf32>
    tpu.vector_store %arg6[%c0_17, %c0_18], %21 {strides = array<i32>} : memref<4x1xf32, #tpu.memory_space<vmem>>, vector<4x1xf32>,
    return
  }
  func.func @transform_0(%arg0: i32, %arg1: i32) -> (i32, i32, i32) {
    %c0_i32 = arith.constant 0 : i32
    %c0_i32_0 = arith.constant 0 : i32
    return %arg0, %c0_i32, %arg1 : i32, i32, i32
  }
  func.func @transform_1(%arg0: i32, %arg1: i32) -> (i32, i32) {
    %c0_i32 = arith.constant 0 : i32
    %c0_i32_0 = arith.constant 0 : i32
    %c0_i32_1 = arith.constant 0 : i32
    return %c0_i32, %c0_i32_0 : i32, i32
  }
  func.func @transform_2(%arg0: i32, %arg1: i32) -> (i32, i32, i32) {
    %c0_i32 = arith.constant 0 : i32
    %c0_i32_0 = arith.constant 0 : i32
    return %arg0, %c0_i32, %arg1 : i32, i32, i32
  }
  func.func @transform_3(%arg0: i32, %arg1: i32) -> (i32, i32) {
    %c0_i32 = arith.constant 0 : i32
    %c0_i32_0 = arith.constant 0 : i32
    %c0_i32_1 = arith.constant 0 : i32
    return %c0_i32, %c0_i32_0 : i32, i32
  }
  func.func @transform_4(%arg0: i32, %arg1: i32) -> (i32, i32) {
    %c0_i32 = arith.constant 0 : i32
    %c0_i32_0 = arith.constant 0 : i32
    %c0_i32_1 = arith.constant 0 : i32
    return %c0_i32, %c0_i32_0 : i32, i32
  }
}

</mosaic_0001>

<bundles_post_ra>
// kernel: tpu_custom_call.1
= control target key start
LH: loop header
LB: loop body
LE: loop exit
PB: predicated region body
PF: predicated region fallthrough
CT: control target
= control target key end

     0   :  { %10 = vsyncpa [#allocation3], 0  ;;  %s982_s0 = inlined_call_operand.hbm [shape: f32[2,8,256], index: 0, kind: input, shape index: {}]   ;;  %s983_s1 = inlined_call_operand.hbm [shape: f32[4,8], index: 1, kind: input, shape index: {}]   ;;  %s984_s2 = inlined_call_operand.hbm [shape: f32[2,4,256], index: 2, kind: output, shape index: {0}]   ;;  %s985_s3 = inlined_call_operand.vmem [shape: f32[4,1], index: 3, kind: output, shape index: {1}]   ;;  %s986_s4 = inlined_call_operand.vmem [shape: f32[4,1], index: 4, kind: output, shape index: {2}]  }
   0x1   :  { %12 = vsyncpa [#allocation3 + $0x1], 0 }
   0x2   :  { %13 = vsyncpa [#allocation6], 0 }
   0x3   :  { %14 = vsyncpa [#allocation4], 0 }
   0x4   :  { %16 = vsyncpa [#allocation4 + $0x1], 0  ;;  %s750_s15 = smov 0   ;;  %s752_s16 = smov 0  }
   0x5   :  { %s754_s17 = smov 0   ;;  %s756_s18 = smov 0  }
   0x6   :  { %s758_s19 = smov 0   ;;  %s760_s20 = smov 0  }
   0x7 LB: > { %s477_s21 = sadd.s32 4294967295, %s718_s20   ;;  %s478_s22 = sadd.s32 4294967294, %s718_s20   ;;  %s718_s20 = sphi %s760_s20, %s22_s20   ;;  %s714_s19 = sphi %s758_s19, %s1011_s19   ;;  %s710_s18 = sphi %s756_s18, %s1010_s18   ;;  %s706_s17 = sphi %s754_s17, %s1009_s17   ;;  %s702_s16 = sphi %s752_s16, %s1008_s16   ;;  %s698_s15 = sphi %s750_s15, %s1007_s15  }
   0x8   : > { %p56_p0 = scmp.ne.s32.totalorder %s702_s16, %s698_s15  ;;  %p784_p1 = scmp.eq.s32.totalorder %s477_s21, 0 }
   0x9   : > { %p788_p2 = scmp.eq.s32.totalorder %s477_s21, 1  ;;  %p109_p3 = scmp.eq.s32.totalorder %s478_s22, 1 }
   0xa   : > { %s991_s23 = scalar_select %p784_p1, 1, 0 }
   0xb   : > { %s992_s24 = scalar_select %p788_p2, 1, 0 }
   0xc   : > { %p794_p4 = por %p784_p1, %p56_p0  ;;  %p479_p5 = scmp.ge.s32.totalorder %s718_s20, 1 }
   0xd   : > { %p799_p6 = por %p109_p3, %p56_p0  ;;  %p158_p7 = scmp.lt.s32.totalorder %s718_s20, 3 }
   0xe   : > { %s993_s25 = scalar_select %p794_p4, 1, 0 }
   0xf   : > { %s994_s26 = scalar_select %p799_p6, 1, 0 }
  0x10   : > { %p804_p8 = pnand %p479_p5, %p158_p7  ;;  %s720_s28 = smov [#allocation5]  }
  0x11   : > { %s171_s29 = sshll.u32 %s720_s28, 4  ;;  %s34_s5 = sadd.s32 1, %s714_s19  ;;  %s172_s29 = int_to_ptr.vmem [resolvable:$true] %s171_s29 }
  0x12   : > { %s995_s27 = scalar_select %p804_p8, 1, 0 }
  0x13   : > { %p507_p10 = pneg %p804_p8  ;;  %s43_s6 = sadd.s32 1, %s706_s17 }
  0x14   : > { %p819_p12 = scmp.ge.s32.totalorder %s34_s5, 2  ;;  %s574_s10 = scalar_lea.hbm %s983_s1, 64 }
  0x15   : > { %p813_p11 = pnand %p507_p10, %p784_p1  ;;  %p575_p13 = scmp.ne.s32.totalorder %s983_s1, %s574_s10 }
  0x16   : > { %s997_s7 = scalar_select %p819_p12, 1, 0 }
  0x17   : > { %p576_p0 = pneg %p813_p11  ;;  %p581_p7 = scmp.lt.u32.totalorder %s574_s10, %s983_s1 }
  0x19   : > { %p577_p3 = pnand %p576_p0, %p575_p13 }
  0x1b   : > { %p578_p5 = pneg %p577_p3 }
  0x1d   : > { %p583_p10 = pnand %p581_p7, %p578_p5 }
  0x1f   : > { %586 = shalt.err (!%p583_p10)
}
  0x20   : > { %s587_s21 = scalar_lea.vmem %s172_s29, 64  ;;  %p595_p4 = scmp.lt.s32.totalorder %s172_s29, %s172_s29 }
  0x21   : > { %p588_p9 = scmp.ne.s32.totalorder %s172_s29, %s587_s21  ;;  %p596_p8 = scmp.lt.s32.totalorder %s587_s21, %s587_s21 }
  0x23   : > { %p590_p6 = pnand %p588_p9, %p576_p0  ;;  %p597_p2 = por %p596_p8, %p595_p4 }
  0x25   : > { %p591_p1 = pneg %p590_p6 }
  0x27   : > { %p598_p12 = pnand %p597_p2, %p591_p1 }
  0x29   : > { %601 = shalt.err (!%p598_p12)
}
  0x2a   : > { %510 = dma.hbm_to_vmem [thread:$0]  (!%p813_p11), %s983_s1, 64, %s172_s29, [#allocation6]  }
  0x2b   : > { %p998_p4 = scmp.ne.s32.totalorder %s997_s7, 0  ;;  %p50_p1 = scmp.ne.s32.totalorder %s706_s17, %s702_s16 }
  0x2c   : > { %p51_p2 = scmp.eq.s32.totalorder %s718_s20, 0  ;;  %p520_p6 = scmp.lt.s32.totalorder %s718_s20, 2 }
  0x2d   : > { %s1013_s5 = smov (%p998_p4, %s34_s5), 0  ;;  %p999_p12 = scmp.ne.s32.totalorder %s992_s24, 0 }
  0x2e   : > { %s38_s30 = ssub.s32 %s714_s19, %s1013_s5  ;;  %p52_p9 = por %p51_p2, %p50_p1 }
  0x2f   : > { %p41_p8 = scmp.eq.s32.totalorder %s38_s30, 0  ;;  %p851_p13 = por %p999_p12, %p50_p1 }
  0x30   : > { %s182_s9 = sand.u32 1, %s706_s17   ;;  %s496_s7 = sshll.u32 %s714_s19, 8 }
  0x31   : > { %s859_s10 = scalar_select %p41_p8, %s706_s17, %s43_s6  }
  0x32   : > { %s482_s29 = sshll.u32 %s182_s9, 4  ;;  %s865_s13 = scalar_lea.hbm %s982_s0, %s496_s7 }
  0x33   : > { %s186_s24 = scalar_lea.vmem [#allocation2], %s482_s29  ;;  %p869_p11 = pnand %p520_p6, %p52_p9 }
  0x34   : > { %s196_s14 = sshll.u32 %s186_s24, 4  ;;  %s183_s6 = scalar_lea.sflag [#allocation3], %s182_s9  ;;  %s867_s14 = int_to_ptr.vmem [resolvable:$true] %s196_s14 }
  0x35   : > { %s602_s22 = scalar_lea.hbm %s865_s13, 256  ;;  %p604_p3 = pneg %p869_p11 }
  0x36   : > { %p603_p0 = scmp.ne.s32.totalorder %s865_s13, %s602_s22  ;;  %s607_s29 = scalar_lea.hbm %s982_s0, 512 }
  0x37   : > { %p608_p10 = scmp.lt.u32.totalorder %s865_s13, %s982_s0  ;;  %p609_p4 = scmp.lt.u32.totalorder %s607_s29, %s602_s22 }
  0x38   : > { %p605_p5 = pnand %p604_p3, %p603_p0  ;;  %p611_p2 = scmp.lt.u32.totalorder %s602_s22, %s865_s13 }
  0x39   : > { %p610_p1 = por %p609_p4, %p608_p10 }
  0x3a   : > { %p606_p7 = pneg %p605_p5 }
  0x3b   : > { %p612_p6 = por %p611_p2, %p610_p1 }
  0x3d   : > { %p613_p8 = pnand %p612_p6, %p606_p7 }
  0x3f   : > { %616 = shalt.err (!%p613_p8)
}
  0x40   : > { %s617_s9 = scalar_lea.vmem %s867_s14, 256  ;;  %s721_s12 = smov [#allocation2]  }
  0x41   : > { %p618_p9 = scmp.ne.s32.totalorder %s867_s14, %s617_s9  ;;  %s622_s24 = sshll.u32 %s721_s12, 4  ;;  %s623_s24 = int_to_ptr.vmem [resolvable:$false] %s622_s24 }
  0x42   : > { %s624_s28 = scalar_lea.vmem %s623_s24, 512  ;;  %p625_p5 = scmp.lt.s32.totalorder %s867_s14, %s623_s24 }
  0x43   : > { %p620_p12 = pnand %p618_p9, %p604_p3  ;;  %p626_p10 = scmp.lt.s32.totalorder %s624_s28, %s617_s9 }
  0x45   : > { %p621_p0 = pneg %p620_p12  ;;  %p627_p4 = por %p626_p10, %p625_p5 }
  0x47   : > { %p628_p1 = pnand %p627_p4, %p621_p0 }
  0x49   : > { %631 = shalt.err (!%p628_p1)
}
  0x4a   : > { %514 = dma.hbm_to_vmem [thread:$0]  (!%p869_p11), %s865_s13, 256, %s867_s14, %s183_s6  }
  0x4b   : > { %p1002_p7 = scmp.ne.s32.totalorder %s995_s27, 0 }
  0x4c   : > { %s901_s22 = sand.u32 (!%p1002_p7), 1, %s702_s16   ;;  %p1003_p3 = scmp.ne.s32.totalorder (!%p1002_p7), %s993_s25, 0 }
  0x4d   : > { %205 = sbr.rel (%p1002_p7) target bundleno = 460 (0x1cc), region = 28  ;;  %s486_s30 = sshll.u32 (!%p1002_p7), %s901_s22, 4 }
  0x4e   : > { %s208_s29 = scalar_lea.sflag (!%p1002_p7), [#allocation3], %s901_s22  ;;  %s211_s7 = scalar_lea.vmem (!%p1002_p7), [#allocation2], %s486_s30 }
  0x54   : > { %685 = dma.done.wait (%p1003_p3), %s208_s29, 256  }
  0x55   : > { %687 = vsyncadd (%p1003_p3), %s208_s29, 4294967040  ;;  %p1004_p2 = scmp.ne.s32.totalorder %s991_s23, 0 }
  0x57   : > { %689 = dma.done.wait (%p1004_p2), [#allocation6], 64  }
  0x58   : > { %691 = vsyncadd (%p1004_p2), [#allocation6], 4294967232  ;;  %p242_p11 = scmp.eq.s32.totalorder %s710_s18, 0  ;;  %v722_v0 = vmov 0.0   ;;  %v247_v1 = vld [vmem:[%s211_s7 + $0x8] sm:$0xff]  ;;  %v246_v2 = vld [vmem:[%s211_s7] sm:$0xff] }
  0x59   : > { %317 = vmatprep.mubr.f32.mxu0 %v722_v0  ;;  %v248_v3 = vld [vmem:[#allocation5] sm:$0xf]  ;;  %vm249_vm0 = vcmask 64512   ;;  %253 = vmatprep.subr.mxu0 %v247_v1  ;;  %s488_s25 = sshll.u32 %s901_s22, 3  ;;  %vm331_vm1 = vcmask (%p242_p11), 3072   ;;  %v723_v7 = vmov (%p242_p11), 0.0  }
  0x5a   : > { %254 = vmatpush1.msra.mxu0 %v246_v2  ;;  %s235_s27 = scalar_lea.vmem [#allocation7], %s488_s25  ;;  %332 = vst.msk [vmem:[%s985_s3] sm:$0xf] (%p242_p11), %vm331_vm1, %v723_v7  ;;  %333 = vst.msk [vmem:[%s986_s4] sm:$0xf] (%p242_p11), %vm331_vm1, %v723_v7 }
  0x5b   : > { %490 = vmatmul.mubr.msk.f32.vlgmr.msra.gmra.mrb[0].mxu0 %vm249_vm0, %v248_v3 }
 0x12c   : > { %330 = sbr.rel (!%p242_p11) target bundleno = 307 (0x133), region = 40 }
 0x12e   : > { %v319_v4 = vpop.f32.mrb[0].mxu0 }
 0x12f   : > { %v321_v5 = vpop.f32.mrb[1].mxu0 }
 0x130   : > { %v326_v6 = vcombine.low %v319_v4, %v321_v5 }
 0x132   : > { %328 = vst [vmem:[%s235_s27] sm:$0xff] %v326_v6 }
 0x133 PF: > { %vm335_vm2 = vcmask 1043456   ;;  %v345_v8 = vmul.f32 %v319_v4, %v319_v4  ;;  %v346_v9 = vmul.f32 %v321_v5, %v321_v5  ;;  %s498_s6 = sshll.u32 %s710_s18, 7  ;;  %s371_s11 = sshll.u32 %s235_s27, 4  ;;  %s372_s11 = int_to_ptr.vmem [resolvable:$true] %s371_s11 }
 0x134   : > { %v336_v10 = vsel %vm335_vm2, %v319_v4, 0.0  ;;  %v337_v11 = vsel %vm335_vm2, %v321_v5, 0.0  ;;  %s927_s24 = scalar_lea.hbm %s984_s2, %s498_s6  ;;  %s355_s28 = scalar_lea.sflag [#allocation4], %s901_s22 }
 0x135   : > { %v338_v12 = vadd.f32 %v337_v11, %v336_v10  ;;  %v347_v13 = vsel %vm335_vm2, %v345_v8, 0.0  ;;  %v348_v14 = vsel %vm335_vm2, %v346_v9, 0.0  ;;  %s632_s30 = scalar_lea.vmem %s372_s11, 128  ;;  %s724_s29 = smov [#allocation7]  }
 0x136   : > { %v349_v15 = vadd.f32 %v348_v14, %v347_v13  ;;  %p633_p6 = scmp.ne.s32.totalorder %s372_s11, %s632_s30  ;;  %s636_s7 = sshll.u32 %s724_s29, 4  ;;  %s637_s7 = int_to_ptr.vmem [resolvable:$false] %s636_s7 }
 0x137   : > { %339 = vadd.xlane.f32.xlu0 %v338_v12  ;;  %s638_s25 = scalar_lea.vmem %s637_s7, 256  ;;  %p639_p12 = scmp.lt.s32.totalorder %s372_s11, %s637_s7 }
 0x138   : > { %p634_p8 = pnand %p633_p6, %p851_p13  ;;  %p640_p0 = scmp.lt.s32.totalorder %s638_s25, %s632_s30 }
 0x13a   : > { %p635_p9 = pneg %p634_p8  ;;  %p641_p5 = por %p640_p0, %p639_p12 }
 0x13b   : > { %350 = vadd.xlane.f32.xlu0 %v349_v15 }
 0x13c   : > { %p642_p10 = pnand %p641_p5, %p635_p9 }
 0x13e   : > { %645 = shalt.err (!%p642_p10)
}
 0x13f   : > { %s646_s18 = scalar_lea.hbm %s927_s24, 128  ;;  %s650_s23 = scalar_lea.hbm %s984_s2, 256 }
 0x140   : > { %p647_p4 = scmp.ne.s32.totalorder %s927_s24, %s646_s18  ;;  %p651_p3 = scmp.lt.u32.totalorder %s927_s24, %s984_s2 }
 0x141   : > { %p652_p2 = scmp.lt.u32.totalorder %s650_s23, %s646_s18  ;;  %p654_p6 = scmp.lt.u32.totalorder %s646_s18, %s927_s24 }
 0x142   : > { %p648_p1 = pnand %p647_p4, %p851_p13 }
 0x143   : > { %p653_p11 = por %p652_p2, %p651_p3 }
 0x144   : > { %p649_p7 = pneg %p648_p1 }
 0x145   : > { %p655_p8 = por %p654_p6, %p653_p11 }
 0x147   : > { %p656_p9 = pnand %p655_p8, %p649_p7 }
 0x149   : > { %659 = shalt.err (!%p656_p9)
}
 0x14a   : > { %505 = dma.vmem_to_hbm [thread:$0]  (%p851_p13), %s372_s11, 128, %s927_s24, %s355_s28   ;;  %v334_v16 = vld [vmem:[%s985_s3] sm:$0xf]  ;;  %vm342_vm3 = vcmask 3072  }
 0x14b   : > { %v344_v19 = vld [vmem:[%s986_s4] sm:$0xf] }
 0x1c4   : > { %v340_v17 = vpop.xlane.xlu0 %339 }
 0x1c5   : > { %v341_v18 = vadd.f32 %v340_v17, %v334_v16 }
 0x1c7   : > { %343 = vst.msk [vmem:[%s985_s3] sm:$0xf] %vm342_vm3, %v341_v18 }
 0x1c8   : > { %v351_v20 = vpop.xlane.xlu0 %350 }
 0x1c9   : > { %v352_v21 = vadd.f32 %v351_v20, %v344_v19 }
 0x1cb   : > { %353 = vst.msk [vmem:[%s986_s4] sm:$0xf] %vm342_vm3, %v352_v21 }
 0x1cc PF: > { %s395_s11 = sand.u32 1, %s698_s15   ;;  %p1005_p13 = scmp.ne.s32.totalorder %s994_s26, 0 }
 0x1cd   : > { %p1006_p12 = scmp.ge.s32.totalorder %s718_s20, 2  ;;  %s396_s24 = scalar_lea.sflag [#allocation4], %s395_s11 }
 0x1cf   : > { %p516_p0 = pnand %p1006_p12, %p1005_p13 }
 0x1d1   : > { %693 = dma.done.wait (!%p516_p0), %s396_s24, 128  }
 0x1d2   : > { %695 = vsyncadd (!%p516_p0), %s396_s24, 4294967168  ;;  %s22_s20 = sadd.s32 1, %s718_s20   ;;  %s1007_s15 = smov %s702_s16 }
 0x1d3   : > { %p19_p5 = scmp.ge.s32.totalorder %s22_s20, 4   ;;  %s1008_s16 = smov %s706_s17 }
 0x1d4   : > { %s1009_s17 = smov %s859_s10  ;;  %s1010_s18 = smov %s714_s19 }
 0x1d5   : > { %s1011_s19 = smov %s1013_s5  ;;  %21 = sbr.rel (!%p19_p5) target bundleno = 7 (0x7), region = 97 }
 0x1dc   :  { %401 = vsyncpa [#allocation3], 1 }
 0x1dd   :  { %403 = vsyncpa [#allocation3 + $0x1], 1 }
 0x1de   :  { %404 = vsyncpa [#allocation6], 1 }
 0x1df   :  { %405 = vsyncpa [#allocation4], 1 }
 0x1e0   :  { %407 = vsyncpa [#allocation4 + $0x1], 1 }

</bundles_post_ra>
